<compile_context>
chip_gen: v5e
topology: v5e:2x2
jax: 0.10.0
libtpu: 0.0.40
codegen_flags: <defaults>
</compile_context>

<pallas_src>
import functools

import jax
import jax.numpy as jnp
from jax.experimental import pallas as pl
from jax.experimental.pallas import tpu as pltpu


def _round_up(n, m):
    return ((n + m - 1) // m) * m


def _mlp_kernel(x_ref, w1_ref, b1_ref, w2_ref, b2_ref, w3_ref, b3_ref, o_ref):
    # Cast x to the matmul operand dtype *inside* the kernel: a wrapper-side
    # astype would be an extra read+write HBM pass over the x stream, which is
    # what this mem-bound kernel is limited by.
    x = x_ref[...].astype(w1_ref.dtype)
    h1 = jnp.dot(x, w1_ref[...], preferred_element_type=jnp.float32) + b1_ref[...]
    h1 = jnp.maximum(h1, 0.0).astype(w2_ref.dtype)
    h2 = jnp.dot(h1, w2_ref[...], preferred_element_type=jnp.float32) + b2_ref[...]
    h2 = jnp.maximum(h2, 0.0).astype(w3_ref.dtype)
    out = jnp.dot(h2, w3_ref[...], preferred_element_type=jnp.float32) + b3_ref[...]
    o_ref[...] = out.astype(o_ref.dtype)


def prepare_params(params, compute_dtype=jnp.float32):
    """One-time parameter prep (hoisted out of the per-call forward).

    - Pads fc3 to a lane-dense 128 output columns (unmasked output stores,
      full 128-wide MXU tile); the forward slices [:, :nb_classes].
    - Casts matmul weights to compute_dtype (bf16 for full-rate MXU).
    - Biases stay float32 (f32 epilogue / accumulation).
    """
    w1, b1 = params["w1"], params["b1"]
    w2, b2 = params["w2"], params["b2"]
    w3, b3 = params["w3"], params["b3"]
    nb_classes = w3.shape[1]
    n_pad = _round_up(max(nb_classes, 1), 128)
    w3p = jnp.zeros((128, n_pad), w3.dtype).at[:, :nb_classes].set(w3)
    b3p = jnp.zeros((1, n_pad), b3.dtype).at[:, :nb_classes].set(b3)
    return {
        "w1": w1.astype(compute_dtype),
        "b1": b1.astype(jnp.float32),
        "w2": w2.astype(compute_dtype),
        "b2": b2.astype(jnp.float32),
        "w3": w3p.astype(compute_dtype),
        "b3": b3p.astype(jnp.float32),
    }


def _choose_block(B, block_b):
    """Pick the batch tile (rows per grid step)."""
    # Multiple of 16 keeps both f32 (8,128) and bf16 (16,128) layouts happy.
    # Cap at 2048 rows: f32 working set ~15 MiB incl. double-buffering, safely
    # inside v7x's 32 MiB scoped-VMEM default (v5e/v6e have more headroom).
    block_b = max(16, min(_round_up(block_b, 16), 2048))
    if B <= 128:
        # Tiny batch: one full-extent block (legal even when B % 8 != 0).
        return B
    # Ensure at least 2 grid steps so both v7x TensorCores get work, without
    # exceeding block_b. Ragged remainders become a masked partial last block.
    half = _round_up((B + 1) // 2, 16)
    return min(block_b, half)


@functools.partial(jax.jit, static_argnames=("nb_classes", "block_b", "out_dtype"))
def classifier_mnist_512_forward(x, prep, nb_classes, block_b=1024,
                                 out_dtype=jnp.float32):
    """x: [B, 512]. prep: output of prepare_params(). Returns [B, nb_classes]."""
    B, D_in = x.shape
    assert D_in == 512, "Classifier_MNIST_512_features expects 512 input features"
    n_pad = prep["w3"].shape[1]

    eff_block = _choose_block(B, block_b)
    # Ragged batches: cdiv grid + masked partial last block (no jnp.pad copy).
    grid = (pl.cdiv(B, eff_block),)

    w_itemsize = jnp.dtype(prep["w1"].dtype).itemsize
    weight_elems = 512 * 256 + 256 * 128 + 128 * n_pad
    cost = pl.CostEstimate(
        flops=2 * B * weight_elems,
        transcendentals=0,
        bytes_accessed=(B * 512 * jnp.dtype(x.dtype).itemsize      # x stream
                        + B * n_pad * jnp.dtype(out_dtype).itemsize  # output
                        + weight_elems * w_itemsize                  # weights
                        + (256 + 128 + n_pad) * 4),                  # biases
    )

    out = pl.pallas_call(
        _mlp_kernel,
        out_shape=jax.ShapeDtypeStruct((B, n_pad), out_dtype),
        grid_spec=pltpu.PrefetchScalarGridSpec(
            num_scalar_prefetch=0,
            grid=grid,
            in_specs=[
                # x tile: [eff_block, 512], marches over the batch.
                pl.BlockSpec((eff_block, 512), lambda i: (i, 0)),
                # weights / biases: full arrays, constant index -> resident.
                pl.BlockSpec((512, 256), lambda i: (0, 0)),
                pl.BlockSpec((1, 256), lambda i: (0, 0)),
                pl.BlockSpec((256, 128), lambda i: (0, 0)),
                pl.BlockSpec((1, 128), lambda i: (0, 0)),
                pl.BlockSpec((128, n_pad), lambda i: (0, 0)),
                pl.BlockSpec((1, n_pad), lambda i: (0, 0)),
            ],
            out_specs=pl.BlockSpec((eff_block, n_pad), lambda i: (i, 0)),
        ),
        compiler_params=pltpu.CompilerParams(
            dimension_semantics=("parallel",),
        ),
        cost_estimate=cost,
    )(x, prep["w1"], prep["b1"], prep["w2"], prep["b2"], prep["w3"], prep["b3"])

    # Rows are already exact (no batch padding); drop only the zero-padded
    # class columns to match the module's [B, nb_classes] contract.
    return out[:, :nb_classes]


def init_params(key, nb_classes=10):
    """Deterministic init mimicking nn.Linear's scale. Weights stored [in, out]."""
    ks = jax.random.split(key, 6)

    def linear(kw, kb, fan_in, fan_out):
        bound = 1.0 / jnp.sqrt(jnp.float32(fan_in))
        w = jax.random.uniform(kw, (fan_in, fan_out), jnp.float32, -bound, bound)
        b = jax.random.uniform(kb, (1, fan_out), jnp.float32, -bound, bound)
        return w, b

    w1, b1 = linear(ks[0], ks[1], 512, 256)
    w2, b2 = linear(ks[2], ks[3], 256, 128)
    w3, b3 = linear(ks[4], ks[5], 128, nb_classes)
    return {"w1": w1, "b1": b1, "w2": w2, "b2": b2, "w3": w3, "b3": b3}


def _reference(x, p):
    h1 = jnp.maximum(x @ p["w1"] + p["b1"], 0.0)
    h2 = jnp.maximum(h1 @ p["w2"] + p["b2"], 0.0)
    return h2 @ p["w3"] + p["b3"]


if __name__ == "__main__":
    key = jax.random.PRNGKey(0)
    k_params, k_x = jax.random.split(key)

    nb_classes = 10
    params = init_params(k_params, nb_classes=nb_classes)

    # One-time param prep (padded fc3 + optional dtype cast), hoisted out of
    # the forward.
    prep_f32 = prepare_params(params, compute_dtype=jnp.float32)

    # Small batch, f32 path: single full-extent block, grid=(1,).
    batch = 32
    x = jax.random.normal(k_x, (batch, 512), dtype=jnp.float32)
    out = jax.block_until_ready(
        classifier_mnist_512_forward(x, prep_f32, nb_classes=nb_classes))
    ref = _reference(x, params)
    assert out.shape == (batch, nb_classes)
    assert jnp.allclose(out, ref, atol=1e-4, rtol=1e-4), "f32 mismatch vs reference"

    # Ragged mid-size batch: >=2 grid steps (both v7x TCs) + masked partial
    # last block, no jnp.pad pass over x.
    x2 = jax.random.normal(jax.random.PRNGKey(1), (300, 512), dtype=jnp.float32)
    out2 = jax.block_until_ready(
        classifier_mnist_512_forward(x2, prep_f32, nb_classes=nb_classes))
    ref2 = _reference(x2, params)
    assert out2.shape == (300, nb_classes)
    assert jnp.allclose(out2, ref2, atol=1e-4, rtol=1e-4), "ragged mismatch vs reference"

    # bf16 matmul-operand path (full-rate MXU on v5e/v6e/v7x); x stays f32 in
    # HBM and is cast in-kernel; bias-add / ReLU / accumulation stay f32.
    prep_bf16 = prepare_params(params, compute_dtype=jnp.bfloat16)
    out_bf16 = jax.block_until_ready(
        classifier_mnist_512_forward(x, prep_bf16, nb_classes=nb_classes))
    assert out_bf16.shape == (batch, nb_classes)
    assert jnp.allclose(out_bf16, ref, atol=1e-1, rtol=1e-1), "bf16 mismatch vs reference"

    print("KERNEL_OK")
</pallas_src>

<mosaic_0001>
module attributes {stable_mosaic.version = 11 : i64} {
  func.func @_mlp_kernel(%arg0: i32, %arg1: memref<32x512xf32, #tpu.memory_space<vmem>>, %arg2: memref<512x256xf32, #tpu.memory_space<vmem>>, %arg3: memref<1x256xf32, #tpu.memory_space<vmem>>, %arg4: memref<256x128xf32, #tpu.memory_space<vmem>>, %arg5: memref<1x128xf32, #tpu.memory_space<vmem>>, %arg6: memref<128x128xf32, #tpu.memory_space<vmem>>, %arg7: memref<1x128xf32, #tpu.memory_space<vmem>>, %arg8: memref<32x128xf32, #tpu.memory_space<vmem>>) attributes {dimension_semantics = [#tpu.dimension_semantics<parallel>], iteration_bounds = array<i64: 1>, scalar_prefetch = 0 : i64, scratch_operands = 0 : i64, tpu.core_type = #tpu.core_type<tc>, window_params = [{transform_indices = @transform_0, window_bounds = array<i64: 32, 512>}, {pipeline_mode = #tpu.pipeline_mode<synchronous>, transform_indices = @transform_1, window_bounds = array<i64: 512, 256>}, {pipeline_mode = #tpu.pipeline_mode<synchronous>, transform_indices = @transform_2, window_bounds = array<i64: 1, 256>}, {pipeline_mode = #tpu.pipeline_mode<synchronous>, transform_indices = @transform_3, window_bounds = array<i64: 256, 128>}, {pipeline_mode = #tpu.pipeline_mode<synchronous>, transform_indices = @transform_4, window_bounds = array<i64: 1, 128>}, {pipeline_mode = #tpu.pipeline_mode<synchronous>, transform_indices = @transform_5, window_bounds = array<i64: 128, 128>}, {pipeline_mode = #tpu.pipeline_mode<synchronous>, transform_indices = @transform_6, window_bounds = array<i64: 1, 128>}, {transform_indices = @transform_7, window_bounds = array<i64: 32, 128>}]} {
    %c0 = arith.constant 0 : index
    %c0_0 = arith.constant 0 : index
    %0 = vector.load %arg1[%c0, %c0_0] : memref<32x512xf32, #tpu.memory_space<vmem>>, vector<32x512xf32>
    %c0_1 = arith.constant 0 : index
    %c0_2 = arith.constant 0 : index
    %1 = vector.load %arg2[%c0_1, %c0_2] : memref<512x256xf32, #tpu.memory_space<vmem>>, vector<512x256xf32>
    %cst = arith.constant dense<0.000000e+00> : vector<32x256xf32>
    %2 = tpu.matmul %0, %1, %cst {dimension_numbers = #tpu.dot_dimension_numbers<[1], [0], [0], [1], [0, 0, 1, 1], [], []>} : vector<32x512xf32>, vector<512x256xf32>, vector<32x256xf32> -> vector<32x256xf32>
    %c0_3 = arith.constant 0 : index
    %c0_4 = arith.constant 0 : index
    %3 = vector.load %arg3[%c0_3, %c0_4] : memref<1x256xf32, #tpu.memory_space<vmem>>, vector<1x256xf32>
    %4 = vector.broadcast %3 : vector<1x256xf32> to vector<32x256xf32>
    %5 = arith.addf %2, %4 : vector<32x256xf32>
    %cst_5 = arith.constant 0.000000e+00 : f32
    %6 = vector.broadcast %cst_5 : f32 to vector<32x256xf32>
    %7 = arith.maximumf %5, %6 : vector<32x256xf32>
    %c0_6 = arith.constant 0 : index
    %c0_7 = arith.constant 0 : index
    %8 = vector.load %arg4[%c0_6, %c0_7] : memref<256x128xf32, #tpu.memory_space<vmem>>, vector<256x128xf32>
    %cst_8 = arith.constant dense<0.000000e+00> : vector<32x128xf32>
    %9 = tpu.matmul %7, %8, %cst_8 {dimension_numbers = #tpu.dot_dimension_numbers<[1], [0], [0], [1], [0, 0, 1, 1], [], []>} : vector<32x256xf32>, vector<256x128xf32>, vector<32x128xf32> -> vector<32x128xf32>
    %c0_9 = arith.constant 0 : index
    %c0_10 = arith.constant 0 : index
    %10 = vector.load %arg5[%c0_9, %c0_10] : memref<1x128xf32, #tpu.memory_space<vmem>>, vector<1x128xf32>
    %11 = vector.broadcast %10 : vector<1x128xf32> to vector<32x128xf32>
    %12 = arith.addf %9, %11 : vector<32x128xf32>
    %cst_11 = arith.constant 0.000000e+00 : f32
    %13 = vector.broadcast %cst_11 : f32 to vector<32x128xf32>
    %14 = arith.maximumf %12, %13 : vector<32x128xf32>
    %c0_12 = arith.constant 0 : index
    %c0_13 = arith.constant 0 : index
    %15 = vector.load %arg6[%c0_12, %c0_13] : memref<128x128xf32, #tpu.memory_space<vmem>>, vector<128x128xf32>
    %cst_14 = arith.constant dense<0.000000e+00> : vector<32x128xf32>
    %16 = tpu.matmul %14, %15, %cst_14 {dimension_numbers = #tpu.dot_dimension_numbers<[1], [0], [0], [1], [0, 0, 1, 1], [], []>} : vector<32x128xf32>, vector<128x128xf32>, vector<32x128xf32> -> vector<32x128xf32>
    %c0_15 = arith.constant 0 : index
    %c0_16 = arith.constant 0 : index
    %17 = vector.load %arg7[%c0_15, %c0_16] : memref<1x128xf32, #tpu.memory_space<vmem>>, vector<1x128xf32>
    %18 = vector.broadcast %17 : vector<1x128xf32> to vector<32x128xf32>
    %19 = arith.addf %16, %18 : vector<32x128xf32>
    %c0_17 = arith.constant 0 : index
    %c0_18 = arith.constant 0 : index
    %20 = vector.load %arg8[%c0_17, %c0_18] : memref<32x128xf32, #tpu.memory_space<vmem>>, vector<32x128xf32>
    tpu.vector_store %arg8[%c0_17, %c0_18], %19 {strides = array<i32>} : memref<32x128xf32, #tpu.memory_space<vmem>>, vector<32x128xf32>,
    return
  }
  func.func @transform_0(%arg0: i32) -> (i32, i32) {
    %c0_i32 = arith.constant 0 : i32
    %c0_i32_0 = arith.constant 0 : i32
    return %arg0, %c0_i32 : i32, i32
  }
  func.func @transform_1(%arg0: i32) -> (i32, i32) {
    %c0_i32 = arith.constant 0 : i32
    %c0_i32_0 = arith.constant 0 : i32
    %c0_i32_1 = arith.constant 0 : i32
    return %c0_i32, %c0_i32_0 : i32, i32
  }
  func.func @transform_2(%arg0: i32) -> (i32, i32) {
    %c0_i32 = arith.constant 0 : i32
    %c0_i32_0 = arith.constant 0 : i32
    %c0_i32_1 = arith.constant 0 : i32
    return %c0_i32, %c0_i32_0 : i32, i32
  }
  func.func @transform_3(%arg0: i32) -> (i32, i32) {
    %c0_i32 = arith.constant 0 : i32
    %c0_i32_0 = arith.constant 0 : i32
    %c0_i32_1 = arith.constant 0 : i32
    return %c0_i32, %c0_i32_0 : i32, i32
  }
  func.func @transform_4(%arg0: i32) -> (i32, i32) {
    %c0_i32 = arith.constant 0 : i32
    %c0_i32_0 = arith.constant 0 : i32
    %c0_i32_1 = arith.constant 0 : i32
    return %c0_i32, %c0_i32_0 : i32, i32
  }
  func.func @transform_5(%arg0: i32) -> (i32, i32) {
    %c0_i32 = arith.constant 0 : i32
    %c0_i32_0 = arith.constant 0 : i32
    %c0_i32_1 = arith.constant 0 : i32
    return %c0_i32, %c0_i32_0 : i32, i32
  }
  func.func @transform_6(%arg0: i32) -> (i32, i32) {
    %c0_i32 = arith.constant 0 : i32
    %c0_i32_0 = arith.constant 0 : i32
    %c0_i32_1 = arith.constant 0 : i32
    return %c0_i32, %c0_i32_0 : i32, i32
  }
  func.func @transform_7(%arg0: i32) -> (i32, i32) {
    %c0_i32 = arith.constant 0 : i32
    %c0_i32_0 = arith.constant 0 : i32
    return %arg0, %c0_i32 : i32, i32
  }
}

</mosaic_0001>

<bundles_post_ra>
// kernel: classifier_mnist_512_forward.1
= control target key start
LH: loop header
LB: loop body
LE: loop exit
PB: predicated region body
PF: predicated region fallthrough
CT: control target
= control target key end

     0   :  { %12 = vsyncpa [#allocation3], 0  ;;  %s953_s0 = inlined_call_operand.hbm [shape: f32[32,512], index: 0, kind: input, shape index: {}]   ;;  %s954_s1 = inlined_call_operand.hbm [shape: f32[512,256], index: 1, kind: input, shape index: {}]   ;;  %s955_s2 = inlined_call_operand.hbm [shape: f32[1,256], index: 2, kind: input, shape index: {}]   ;;  %s956_s3 = inlined_call_operand.hbm [shape: f32[256,128], index: 3, kind: input, shape index: {}]   ;;  %s957_s4 = inlined_call_operand.vmem [shape: f32[1,128], index: 4, kind: input, shape index: {}]   ;;  %s958_s5 = inlined_call_operand.hbm [shape: f32[128,128], index: 5, kind: input, shape index: {}]   ;;  %s959_s6 = inlined_call_operand.vmem [shape: f32[1,128], index: 6, kind: input, shape index: {}]   ;;  %s960_s7 = inlined_call_operand.vmem [shape: f32[32,128], index: 7, kind: output, shape index: {}]  }
   0x1   :  { %13 = vsyncpa [#allocation5], 0  ;;  %s32_s26 = sshll.u32 %s954_s1, 4  ;;  %s33_s26 = int_to_ptr.hbm [resolvable:$true] %s32_s26 }
   0x2   :  { %14 = vsyncpa [#allocation8], 0  ;;  %s805_s27 = smov [#allocation4]   ;;  %s56_s8 = sshll.u32 %s956_s3, 4  ;;  %s57_s8 = int_to_ptr.hbm [resolvable:$true] %s56_s8 }
   0x3   :  { %s34_s28 = sshll.u32 %s805_s27, 4  ;;  %s806_s9 = smov 256   ;;  %s35_s28 = int_to_ptr.vmem [resolvable:$true] %s34_s28 }
   0x4   :  { %s807_s10 = smov 16   ;;  %s808_s11 = smov [#allocation7]  }
   0x5   :  { %40 = dma.hbm_to_vmem [thread:$0]  %s33_s26, 16384, %s35_s28, [#allocation5], %s806_s9, %s806_s9, %s807_s10  }
   0x6   :  { %s58_s12 = sshll.u32 %s808_s11, 4  ;;  %s809_s13 = smov 128   ;;  %s59_s12 = int_to_ptr.vmem [resolvable:$true] %s58_s12 }
   0x7   :  { %s810_s14 = smov 8   ;;  %s19_s16 = sshll.u32 %s953_s0, 4  ;;  %s20_s16 = int_to_ptr.hbm [resolvable:$true] %s19_s16 }
   0x8   :  { %64 = dma.hbm_to_vmem [thread:$0]  %s57_s8, 4096, %s59_s12, [#allocation8], %s809_s13, %s809_s13, %s810_s14  }
   0x9   :  { %s811_s17 = smov [#allocation2]   ;;  %s46_s20 = sshll.u32 %s955_s2, 4  ;;  %s47_s20 = int_to_ptr.hbm [resolvable:$true] %s46_s20 }
   0xa   :  { %s21_s18 = sshll.u32 %s811_s17, 4  ;;  %s812_s21 = smov 512   ;;  %s22_s18 = int_to_ptr.vmem [resolvable:$true] %s21_s18 }
   0xb   :  { %s813_s22 = smov 32   ;;  %s814_s23 = smov [#allocation6]  }
   0xc   :  { %27 = dma.hbm_to_vmem [thread:$0]  %s20_s16, 2048, %s22_s18, [#allocation3], %s812_s21, %s812_s21, %s813_s22  }
   0xd   :  { %s48_s24 = sshll.u32 %s814_s23, 4  ;;  %s71_s27 = sshll.u32 %s958_s5, 4  ;;  %s49_s24 = int_to_ptr.vmem [resolvable:$true] %s48_s24  ;;  %s72_s27 = int_to_ptr.hbm [resolvable:$true] %s71_s27 }
   0xe   :  { %51 = dma.hbm_to_vmem [thread:$0]  %s47_s20, 32, %s49_s24, [#allocation5]  }
   0xf   :  { %s815_s0 = smov [#allocation9]  }
  0x10   :  { %s73_s28 = sshll.u32 %s815_s0, 4  ;;  %s74_s28 = int_to_ptr.vmem [resolvable:$true] %s73_s28 }
  0x11   :  { %79 = dma.hbm_to_vmem [thread:$0]  %s72_s27, 2048, %s74_s28, [#allocation8], %s809_s13, %s809_s13, %s810_s14  }
  0x12   :  { %799 = dma.done.wait [#allocation3], 2048  }
  0x13   :  { %800 = vsyncadd [#allocation3], 4294965248 }
  0x14   :  { %801 = dma.done.wait [#allocation5], 16416  }
  0x15   :  { %802 = vsyncadd [#allocation5], 4294950880 }
  0x16   :  { %803 = dma.done.wait [#allocation8], 6144  }
  0x17   :  { %804 = vsyncadd [#allocation8], 4294961152  ;;  %v212_v0 = vld [vmem:[#allocation4 + $0x2f0] sm:$0xff]  ;;  %v210_v2 = vld [vmem:[#allocation4 + $0x2e0] sm:$0xff] }
  0x18   :  { %v148_v1 = vld [vmem:[#allocation4 + $0xf0] sm:$0xff]  ;;  %310 = vmatpush.msra.mxu2 %v212_v0  ;;  %v146_v4 = vld [vmem:[#allocation4 + $0xe0] sm:$0xff]  ;;  %v213_v0 = vld [vmem:[#allocation4 + $0x2f8] sm:$0xff] }
  0x19   :  { %252 = vmatpush.msra.mxu0 %v148_v1  ;;  %v244_v3 = vld [vmem:[#allocation4 + $0x3f0] sm:$0xff]  ;;  %v242_v7 = vld [vmem:[#allocation4 + $0x3e0] sm:$0xff] }
  0x1a   :  { %v180_v5 = vld [vmem:[#allocation4 + $0x1f0] sm:$0xff]  ;;  %339 = vmatpush.msra.mxu3 %v244_v3  ;;  %311 = vmatpush.msra.mxu2 %v210_v2  ;;  %v178_v9 = vld [vmem:[#allocation4 + $0x1e0] sm:$0xff]  ;;  %v875_v2 = vld [vmem:[#allocation2 + $0x18] sm:$0xff] }
  0x1b   :  { %281 = vmatpush.msra.mxu1 %v180_v5  ;;  %v208_v6 = vld [vmem:[#allocation4 + $0x2d0] sm:$0xff]  ;;  %253 = vmatpush.msra.mxu0 %v146_v4  ;;  %v206_v11 = vld [vmem:[#allocation4 + $0x2c0] sm:$0xff]  ;;  %v149_v3 = vld [vmem:[#allocation4 + $0xf8] sm:$0xff] }
  0x1c   :  { %v144_v8 = vld [vmem:[#allocation4 + $0xd0] sm:$0xff]  ;;  %340 = vmatpush.msra.mxu3 %v242_v7  ;;  %v142_v12 = vld [vmem:[#allocation4 + $0xc0] sm:$0xff]  ;;  %312 = vmatpush.msra.mxu2 %v208_v6  ;;  %v211_v4 = vld [vmem:[#allocation4 + $0x2e8] sm:$0xff] }
  0x1d   :  { %v240_v10 = vld [vmem:[#allocation4 + $0x3d0] sm:$0xff]  ;;  %282 = vmatpush.msra.mxu1 %v178_v9  ;;  %254 = vmatpush.msra.mxu0 %v144_v8  ;;  %v238_v14 = vld [vmem:[#allocation4 + $0x3c0] sm:$0xff]  ;;  %v245_v5 = vld [vmem:[#allocation4 + $0x3f8] sm:$0xff] }
  0x1e   :  { %v176_v13 = vld [vmem:[#allocation4 + $0x1d0] sm:$0xff]  ;;  %v174_v15 = vld [vmem:[#allocation4 + $0x1c0] sm:$0xff]  ;;  %341 = vmatpush.msra.mxu3 %v240_v10  ;;  %313 = vmatpush.msra.mxu2 %v206_v11  ;;  %v147_v7 = vld [vmem:[#allocation4 + $0xe8] sm:$0xff] }
  0x1f   :  { %283 = vmatpush.msra.mxu1 %v176_v13  ;;  %v204_v16 = vld [vmem:[#allocation4 + $0x2b0] sm:$0xff]  ;;  %255 = vmatpush.msra.mxu0 %v142_v12  ;;  %v202_v20 = vld [vmem:[#allocation4 + $0x2a0] sm:$0xff]  ;;  %v880_v8 = vld [vmem:[#allocation2 + $0x8] sm:$0xff] }
  0x20   :  { %v140_v17 = vld [vmem:[#allocation4 + $0xb0] sm:$0xff]  ;;  %342 = vmatpush.msra.mxu3 %v238_v14  ;;  %v138_v21 = vld [vmem:[#allocation4 + $0xa0] sm:$0xff]  ;;  %314 = vmatpush.msra.mxu2 %v204_v16  ;;  %v209_v9 = vld [vmem:[#allocation4 + $0x2d8] sm:$0xff] }
  0x21   :  { %v236_v18 = vld [vmem:[#allocation4 + $0x3b0] sm:$0xff]  ;;  %284 = vmatpush.msra.mxu1 %v174_v15  ;;  %256 = vmatpush.msra.mxu0 %v140_v17  ;;  %v234_v22 = vld [vmem:[#allocation4 + $0x3a0] sm:$0xff]  ;;  %v181_v10 = vld [vmem:[#allocation4 + $0x1f8] sm:$0xff] }
  0x22   :  { %v172_v19 = vld [vmem:[#allocation4 + $0x1b0] sm:$0xff]  ;;  %v170_v23 = vld [vmem:[#allocation4 + $0x1a0] sm:$0xff]  ;;  %343 = vmatpush.msra.mxu3 %v236_v18  ;;  %315 = vmatpush.msra.mxu2 %v202_v20  ;;  %v243_v11 = vld [vmem:[#allocation4 + $0x3e8] sm:$0xff] }
  0x23   :  { %285 = vmatpush.msra.mxu1 %v172_v19  ;;  %v200_v24 = vld [vmem:[#allocation4 + $0x290] sm:$0xff]  ;;  %257 = vmatpush.msra.mxu0 %v138_v21  ;;  %v198_v28 = vld [vmem:[#allocation4 + $0x280] sm:$0xff]  ;;  %v145_v12 = vld [vmem:[#allocation4 + $0xd8] sm:$0xff] }
  0x24   :  { %v136_v25 = vld [vmem:[#allocation4 + $0x90] sm:$0xff]  ;;  %344 = vmatpush.msra.mxu3 %v234_v22  ;;  %v134_v29 = vld [vmem:[#allocation4 + $0x80] sm:$0xff]  ;;  %316 = vmatpush.msra.mxu2 %v200_v24  ;;  %v207_v13 = vld [vmem:[#allocation4 + $0x2c8] sm:$0xff] }
  0x25   :  { %v232_v26 = vld [vmem:[#allocation4 + $0x390] sm:$0xff]  ;;  %286 = vmatpush.msra.mxu1 %v170_v23  ;;  %258 = vmatpush.msra.mxu0 %v136_v25  ;;  %v230_v30 = vld [vmem:[#allocation4 + $0x380] sm:$0xff]  ;;  %v179_v14 = vld [vmem:[#allocation4 + $0x1e8] sm:$0xff] }
  0x26   :  { %v168_v27 = vld [vmem:[#allocation4 + $0x190] sm:$0xff]  ;;  %v166_v31 = vld [vmem:[#allocation4 + $0x180] sm:$0xff]  ;;  %345 = vmatpush.msra.mxu3 %v232_v26  ;;  %317 = vmatpush.msra.mxu2 %v198_v28  ;;  %v241_v15 = vld [vmem:[#allocation4 + $0x3d8] sm:$0xff] }
  0x27   :  { %287 = vmatpush.msra.mxu1 %v168_v27  ;;  %v196_v32 = vld [vmem:[#allocation4 + $0x270] sm:$0xff]  ;;  %259 = vmatpush.msra.mxu0 %v134_v29  ;;  %v194_v36 = vld [vmem:[#allocation4 + $0x260] sm:$0xff]  ;;  %v143_v17 = vld [vmem:[#allocation4 + $0xc8] sm:$0xff] }
  0x28   :  { %v132_v33 = vld [vmem:[#allocation4 + $0x70] sm:$0xff]  ;;  %346 = vmatpush.msra.mxu3 %v230_v30  ;;  %v130_v37 = vld [vmem:[#allocation4 + $0x60] sm:$0xff]  ;;  %318 = vmatpush.msra.mxu2 %v196_v32  ;;  %v177_v18 = vld [vmem:[#allocation4 + $0x1d8] sm:$0xff] }
  0x29   :  { %v228_v34 = vld [vmem:[#allocation4 + $0x370] sm:$0xff]  ;;  %288 = vmatpush.msra.mxu1 %v166_v31  ;;  %260 = vmatpush.msra.mxu0 %v132_v33  ;;  %v226_v38 = vld [vmem:[#allocation4 + $0x360] sm:$0xff]  ;;  %v205_v19 = vld [vmem:[#allocation4 + $0x2b8] sm:$0xff] }
  0x2a   :  { %v164_v35 = vld [vmem:[#allocation4 + $0x170] sm:$0xff]  ;;  %v162_v39 = vld [vmem:[#allocation4 + $0x160] sm:$0xff]  ;;  %347 = vmatpush.msra.mxu3 %v228_v34  ;;  %319 = vmatpush.msra.mxu2 %v194_v36  ;;  %v239_v20 = vld [vmem:[#allocation4 + $0x3c8] sm:$0xff] }
  0x2b   :  { %289 = vmatpush.msra.mxu1 %v164_v35  ;;  %v192_v40 = vld [vmem:[#allocation4 + $0x250] sm:$0xff]  ;;  %261 = vmatpush.msra.mxu0 %v130_v37  ;;  %v190_v44 = vld [vmem:[#allocation4 + $0x240] sm:$0xff]  ;;  %v888_v22 = vld [vmem:[#allocation2 + $0x38] sm:$0xff] }
  0x2c   :  { %v128_v41 = vld [vmem:[#allocation4 + $0x50] sm:$0xff]  ;;  %348 = vmatpush.msra.mxu3 %v226_v38  ;;  %v126_v45 = vld [vmem:[#allocation4 + $0x40] sm:$0xff]  ;;  %320 = vmatpush.msra.mxu2 %v192_v40  ;;  %v141_v23 = vld [vmem:[#allocation4 + $0xb8] sm:$0xff] }
  0x2d   :  { %v224_v42 = vld [vmem:[#allocation4 + $0x350] sm:$0xff]  ;;  %290 = vmatpush.msra.mxu1 %v162_v39  ;;  %262 = vmatpush.msra.mxu0 %v128_v41  ;;  %v222_v46 = vld [vmem:[#allocation4 + $0x340] sm:$0xff]  ;;  %v175_v24 = vld [vmem:[#allocation4 + $0x1c8] sm:$0xff] }
  0x2e   :  { %v160_v43 = vld [vmem:[#allocation4 + $0x150] sm:$0xff]  ;;  %v158_v47 = vld [vmem:[#allocation4 + $0x140] sm:$0xff]  ;;  %349 = vmatpush.msra.mxu3 %v224_v42  ;;  %321 = vmatpush.msra.mxu2 %v190_v44  ;;  %v203_v25 = vld [vmem:[#allocation4 + $0x2a8] sm:$0xff] }
  0x2f   :  { %291 = vmatpush.msra.mxu1 %v160_v43  ;;  %v188_v48 = vld [vmem:[#allocation4 + $0x230] sm:$0xff]  ;;  %263 = vmatpush.msra.mxu0 %v126_v45  ;;  %v186_v52 = vld [vmem:[#allocation4 + $0x220] sm:$0xff]  ;;  %v237_v26 = vld [vmem:[#allocation4 + $0x3b8] sm:$0xff] }
  0x30   :  { %v124_v49 = vld [vmem:[#allocation4 + $0x30] sm:$0xff]  ;;  %350 = vmatpush.msra.mxu3 %v222_v46  ;;  %v122_v53 = vld [vmem:[#allocation4 + $0x20] sm:$0xff]  ;;  %322 = vmatpush.msra.mxu2 %v188_v48  ;;  %v891_v27 = vld [vmem:[#allocation2 + $0x28] sm:$0xff] }
  0x31   :  { %v220_v50 = vld [vmem:[#allocation4 + $0x330] sm:$0xff]  ;;  %292 = vmatpush.msra.mxu1 %v158_v47  ;;  %264 = vmatpush.msra.mxu0 %v124_v49  ;;  %v218_v54 = vld [vmem:[#allocation4 + $0x320] sm:$0xff]  ;;  %v139_v28 = vld [vmem:[#allocation4 + $0xa8] sm:$0xff] }
  0x32   :  { %v156_v51 = vld [vmem:[#allocation4 + $0x130] sm:$0xff]  ;;  %v154_v55 = vld [vmem:[#allocation4 + $0x120] sm:$0xff]  ;;  %351 = vmatpush.msra.mxu3 %v220_v50  ;;  %323 = vmatpush.msra.mxu2 %v186_v52  ;;  %v173_v29 = vld [vmem:[#allocation4 + $0x1b8] sm:$0xff] }
  0x33   :  { %293 = vmatpush.msra.mxu1 %v156_v51  ;;  %v184_v56 = vld [vmem:[#allocation4 + $0x210] sm:$0xff]  ;;  %265 = vmatpush.msra.mxu0 %v122_v53  ;;  %v182_v60 = vld [vmem:[#allocation4 + $0x200] sm:$0xff]  ;;  %v201_v30 = vld [vmem:[#allocation4 + $0x298] sm:$0xff] }
  0x34   :  { %v120_v57 = vld [vmem:[#allocation4 + $0x10] sm:$0xff]  ;;  %352 = vmatpush.msra.mxu3 %v218_v54  ;;  %v118_v61 = vld [vmem:[#allocation4] sm:$0xff]  ;;  %324 = vmatpush.msra.mxu2 %v184_v56  ;;  %v235_v31 = vld [vmem:[#allocation4 + $0x3a8] sm:$0xff] }
  0x35   :  { %v216_v58 = vld [vmem:[#allocation4 + $0x310] sm:$0xff]  ;;  %294 = vmatpush.msra.mxu1 %v154_v55  ;;  %266 = vmatpush.msra.mxu0 %v120_v57  ;;  %v214_v63 = vld [vmem:[#allocation4 + $0x300] sm:$0xff]  ;;  %v137_v32 = vld [vmem:[#allocation4 + $0x98] sm:$0xff] }
  0x36   :  { %v152_v59 = vld [vmem:[#allocation4 + $0x110] sm:$0xff]  ;;  %353 = vmatpush.msra.mxu3 %v216_v58  ;;  %v873_v1 = vld [vmem:[#allocation2] sm:$0xff]  ;;  %325 = vmatpush.msra.mxu2 %v182_v60  ;;  %v171_v33 = vld [vmem:[#allocation4 + $0x1a8] sm:$0xff] }
  0x37   :  { %v871_v62 = vld [vmem:[#allocation2 + $0x10] sm:$0xff]  ;;  %295 = vmatpush.msra.mxu1 %v152_v59  ;;  %267 = vmatpush.msra.mxu0 %v118_v61  ;;  %v150_v6 = vld [vmem:[#allocation4 + $0x100] sm:$0xff]  ;;  %v199_v34 = vld [vmem:[#allocation4 + $0x288] sm:$0xff] }
  0x38   :  { %326 = vmatmul.f32.vlgmr.msra.gmra.mxu2 %v871_v62  ;;  %354 = vmatpush.msra.mxu3 %v214_v63  ;;  %v883_v16 = vld [vmem:[#allocation2 + $0x30] sm:$0xff]  ;;  %v885_v21 = vld [vmem:[#allocation2 + $0x20] sm:$0xff]  ;;  %v233_v35 = vld [vmem:[#allocation4 + $0x398] sm:$0xff] }
  0x39   :  { %426 = vmatpush.msrb.mxu2 %v213_v0  ;;  %268 = vmatmul.f32.vlgmr.msra.gmra.mxu0 %v873_v1  ;;  %v895_v36 = vld [vmem:[#allocation2 + $0x50] sm:$0xff]  ;;  %v135_v37 = vld [vmem:[#allocation4 + $0x88] sm:$0xff]  ;;  %v169_v38 = vld [vmem:[#allocation4 + $0x198] sm:$0xff] }
  0x3a   :  { %355 = vmatmul.f32.vlgmr.msra.gmra.mxu3 %v875_v2  ;;  %368 = vmatpush.msrb.mxu0 %v149_v3  ;;  %v197_v39 = vld [vmem:[#allocation4 + $0x278] sm:$0xff]  ;;  %v231_v40 = vld [vmem:[#allocation4 + $0x388] sm:$0xff]  ;;  %v897_v41 = vld [vmem:[#allocation2 + $0x40] sm:$0xff] }
  0x3b   :  { %427 = vmatpush.msrb.mxu2 %v211_v4  ;;  %455 = vmatpush.msrb.mxu3 %v245_v5  ;;  %v900_v42 = vld [vmem:[#allocation2 + $0x58] sm:$0xff]  ;;  %v167_v44 = vld [vmem:[#allocation4 + $0x188] sm:$0xff]  ;;  %v907_v56 = vld [vmem:[#allocation2 + $0x70] sm:$0xff] }
  0x3c   :  { %296 = vmatpush.msra.mxu1 %v150_v6  ;;  %369 = vmatpush.msrb.mxu0 %v147_v7  ;;  %v133_v43 = vld [vmem:[#allocation4 + $0x78] sm:$0xff]  ;;  %v195_v45 = vld [vmem:[#allocation4 + $0x268] sm:$0xff]  ;;  %v909_v61 = vld [vmem:[#allocation2 + $0x60] sm:$0xff] }
  0x3d   :  { %297 = vmatmul.f32.vlgmr.msra.gmra.mxu1 %v880_v8  ;;  %428 = vmatpush.msrb.mxu2 %v209_v9  ;;  %v229_v46 = vld [vmem:[#allocation4 + $0x378] sm:$0xff]  ;;  %v903_v47 = vld [vmem:[#allocation2 + $0x48] sm:$0xff] }
  0x3e   :  { %397 = vmatpush.msrb.mxu1 %v181_v10  ;;  %456 = vmatpush.msrb.mxu3 %v243_v11  ;;  %v131_v48 = vld [vmem:[#allocation4 + $0x68] sm:$0xff]  ;;  %v165_v49 = vld [vmem:[#allocation4 + $0x178] sm:$0xff] }
  0x3f   :  { %370 = vmatpush.msrb.mxu0 %v145_v12  ;;  %429 = vmatpush.msrb.mxu2 %v207_v13  ;;  %v193_v50 = vld [vmem:[#allocation4 + $0x258] sm:$0xff]  ;;  %v227_v51 = vld [vmem:[#allocation4 + $0x368] sm:$0xff] }
  0x40   :  { %398 = vmatpush.msrb.mxu1 %v179_v14  ;;  %457 = vmatpush.msrb.mxu3 %v241_v15  ;;  %v129_v52 = vld [vmem:[#allocation4 + $0x58] sm:$0xff]  ;;  %v163_v53 = vld [vmem:[#allocation4 + $0x168] sm:$0xff] }
  0x41   :  { %329 = vmatmul.f32.gmra.mxu2 %v883_v16  ;;  %371 = vmatpush.msrb.mxu0 %v143_v17  ;;  %v191_v54 = vld [vmem:[#allocation4 + $0x248] sm:$0xff]  ;;  %v225_v55 = vld [vmem:[#allocation4 + $0x358] sm:$0xff] }
  0x42   :  { %399 = vmatpush.msrb.mxu1 %v177_v18  ;;  %430 = vmatpush.msrb.mxu2 %v205_v19  ;;  %v127_v57 = vld [vmem:[#allocation4 + $0x48] sm:$0xff]  ;;  %v161_v58 = vld [vmem:[#allocation4 + $0x158] sm:$0xff] }
  0x43   :  { %458 = vmatpush.msrb.mxu3 %v239_v20  ;;  %271 = vmatmul.f32.gmra.mxu0 %v885_v21  ;;  %v189_v59 = vld [vmem:[#allocation4 + $0x238] sm:$0xff]  ;;  %v223_v60 = vld [vmem:[#allocation4 + $0x348] sm:$0xff] }
  0x44   :  { %358 = vmatmul.f32.gmra.mxu3 %v888_v22  ;;  %372 = vmatpush.msrb.mxu0 %v141_v23  ;;  %v912_v63 = vld [vmem:[#allocation2 + $0x78] sm:$0xff]  ;;  %v159_v3 = vld [vmem:[#allocation4 + $0x148] sm:$0xff] }
  0x45   :  { %400 = vmatpush.msrb.mxu1 %v175_v24  ;;  %431 = vmatpush.msrb.mxu2 %v203_v25  ;;  %v125_v0 = vld [vmem:[#allocation4 + $0x38] sm:$0xff]  ;;  %v187_v4 = vld [vmem:[#allocation4 + $0x228] sm:$0xff] }
  0x46   :  { %459 = vmatpush.msrb.mxu3 %v237_v26  ;;  %300 = vmatmul.f32.gmra.mxu1 %v891_v27  ;;  %v221_v5 = vld [vmem:[#allocation4 + $0x338] sm:$0xff]  ;;  %v915_v6 = vld [vmem:[#allocation2 + $0x68] sm:$0xff] }
  0x47   :  { %373 = vmatpush.msrb.mxu0 %v139_v28  ;;  %401 = vmatpush.msrb.mxu1 %v173_v29  ;;  %v123_v7 = vld [vmem:[#allocation4 + $0x28] sm:$0xff]  ;;  %v157_v9 = vld [vmem:[#allocation4 + $0x138] sm:$0xff] }
  0x48   :  { %432 = vmatpush.msrb.mxu2 %v201_v30  ;;  %460 = vmatpush.msrb.mxu3 %v235_v31  ;;  %v185_v10 = vld [vmem:[#allocation4 + $0x218] sm:$0xff]  ;;  %v219_v11 = vld [vmem:[#allocation4 + $0x328] sm:$0xff] }
  0x49   :  { %374 = vmatpush.msrb.mxu0 %v137_v32  ;;  %402 = vmatpush.msrb.mxu1 %v171_v33  ;;  %v121_v12 = vld [vmem:[#allocation4 + $0x18] sm:$0xff]  ;;  %v155_v13 = vld [vmem:[#allocation4 + $0x128] sm:$0xff] }
  0x4a   :  { %433 = vmatpush.msrb.mxu2 %v199_v34  ;;  %461 = vmatpush.msrb.mxu3 %v233_v35  ;;  %v183_v14 = vld [vmem:[#allocation4 + $0x208] sm:$0xff]  ;;  %v217_v15 = vld [vmem:[#allocation4 + $0x318] sm:$0xff] }
  0x4b   :  { %332 = vmatmul.f32.gmra.mxu2 %v895_v36  ;;  %375 = vmatpush.msrb.mxu0 %v135_v37  ;;  %v119_v17 = vld [vmem:[#allocation4 + $0x8] sm:$0xff]  ;;  %v153_v18 = vld [vmem:[#allocation4 + $0x118] sm:$0xff]  ;;  %v246_v37 = vld [vmem:[#allocation6] sm:$0x3] }
  0x4c   :  { %403 = vmatpush.msrb.mxu1 %v169_v38  ;;  %434 = vmatpush.msrb.mxu2 %v197_v39  ;;  %v215_v19 = vld [vmem:[#allocation4 + $0x308] sm:$0xff]  ;;  %v507_v23 = vld [vmem:[#allocation7 + $0x78] sm:$0xff]  ;;  %v506_v24 = vld [vmem:[#allocation7 + $0x70] sm:$0xff]  ;;  %v248_v39 = vperm.slane %v246_v37, 0 }
  0x4d   :  { %462 = vmatpush.msrb.mxu3 %v231_v40  ;;  %274 = vmatmul.f32.gmra.mxu0 %v897_v41  ;;  %v151_v20 = vld [vmem:[#allocation4 + $0x108] sm:$0xff]  ;;  %v495_v28 = vld [vmem:[#allocation7 + $0x18] sm:$0xff]  ;;  %v494_v29 = vld [vmem:[#allocation7 + $0x10] sm:$0xff] }
  0x4e   :  { %361 = vmatmul.f32.gmra.mxu3 %v900_v42  ;;  %376 = vmatpush.msrb.mxu0 %v133_v43  ;;  %v505_v25 = vld [vmem:[#allocation7 + $0x68] sm:$0xff]  ;;  %v492_v31 = vld [vmem:[#allocation7] sm:$0xff]  ;;  %v523_v32 = vld [vmem:[#allocation7 + $0xf8] sm:$0xff] }
  0x4f   :  { %404 = vmatpush.msrb.mxu1 %v167_v44  ;;  %435 = vmatpush.msrb.mxu2 %v195_v45  ;;  %v497_v26 = vld [vmem:[#allocation7 + $0x28] sm:$0xff]  ;;  %v522_v33 = vld [vmem:[#allocation7 + $0xf0] sm:$0xff]  ;;  %v520_v35 = vld [vmem:[#allocation7 + $0xe0] sm:$0xff] }
  0x50   :  { %463 = vmatpush.msrb.mxu3 %v229_v46  ;;  %303 = vmatmul.f32.gmra.mxu1 %v903_v47  ;;  %v493_v30 = vld [vmem:[#allocation7 + $0x8] sm:$0xff]  ;;  %v518_v38 = vld [vmem:[#allocation7 + $0xd0] sm:$0xff]  ;;  %v515_v44 = vld [vmem:[#allocation7 + $0xb8] sm:$0xff] }
  0x51   :  { %377 = vmatpush.msrb.mxu0 %v131_v48  ;;  %405 = vmatpush.msrb.mxu1 %v165_v49  ;;  %v521_v34 = vld [vmem:[#allocation7 + $0xe8] sm:$0xff]  ;;  %v514_v46 = vld [vmem:[#allocation7 + $0xb0] sm:$0xff] }
  0x52   :  { %436 = vmatpush.msrb.mxu2 %v193_v50  ;;  %464 = vmatpush.msrb.mxu3 %v227_v51  ;;  %v517_v40 = vld [vmem:[#allocation7 + $0xc8] sm:$0xff] }
  0x53   :  { %378 = vmatpush.msrb.mxu0 %v129_v52  ;;  %406 = vmatpush.msrb.mxu1 %v163_v53  ;;  %v513_v51 = vld [vmem:[#allocation7 + $0xa8] sm:$0xff]  ;;  %v512_v53 = vld [vmem:[#allocation7 + $0xa0] sm:$0xff] }
  0x54   :  { %437 = vmatpush.msrb.mxu2 %v191_v54  ;;  %465 = vmatpush.msrb.mxu3 %v225_v55 }
  0x55   :  { %335 = vmatmul.f32.gmra.mxu2 %v907_v56  ;;  %379 = vmatpush.msrb.mxu0 %v127_v57  ;;  %v511_v57 = vld [vmem:[#allocation7 + $0x98] sm:$0xff] }
  0x56   :  { %407 = vmatpush.msrb.mxu1 %v161_v58  ;;  %438 = vmatpush.msrb.mxu2 %v189_v59 }
  0x57   :  { %466 = vmatpush.msrb.mxu3 %v223_v60  ;;  %277 = vmatmul.f32.gmra.mxu0 %v909_v61 }
  0x58   :  { %364 = vmatmul.f32.gmra.mxu3 %v912_v63  ;;  %380 = vmatpush.msrb.mxu0 %v125_v0  ;;  %v509_v0 = vld [vmem:[#allocation7 + $0x88] sm:$0xff] }
  0x59   :  { %408 = vmatpush.msrb.mxu1 %v159_v3  ;;  %439 = vmatpush.msrb.mxu2 %v187_v4 }
  0x5a   :  { %467 = vmatpush.msrb.mxu3 %v221_v5  ;;  %306 = vmatmul.f32.gmra.mxu1 %v915_v6  ;;  %v508_v5 = vld [vmem:[#allocation7 + $0x80] sm:$0xff] }
  0x5b   :  { %381 = vmatpush.msrb.mxu0 %v123_v7  ;;  %409 = vmatpush.msrb.mxu1 %v157_v9 }
  0x5c   :  { %440 = vmatpush.msrb.mxu2 %v185_v10  ;;  %468 = vmatpush.msrb.mxu3 %v219_v11 }
  0x5d   :  { %382 = vmatpush.msrb.mxu0 %v121_v12  ;;  %410 = vmatpush.msrb.mxu1 %v155_v13 }
  0x5e   :  { %441 = vmatpush.msrb.mxu2 %v183_v14  ;;  %469 = vmatpush.msrb.mxu3 %v217_v15 }
  0x5f   :  { %383 = vmatpush.msrb.mxu0 %v119_v17  ;;  %411 = vmatpush.msrb.mxu1 %v153_v18 }
  0x60   :  { %442 = vmatmul.f32.vlgmr.msrb.gmra.mxu2 %v871_v62  ;;  %470 = vmatpush.msrb.mxu3 %v215_v19  ;;  %v504_v62 = vld [vmem:[#allocation7 + $0x60] sm:$0xff] }
  0x61   :  { %384 = vmatmul.f32.vlgmr.msrb.gmra.mxu0 %v873_v1  ;;  %412 = vmatpush.msrb.mxu1 %v151_v20  ;;  %v503_v1 = vld [vmem:[#allocation7 + $0x58] sm:$0xff] }
  0x62   :  { %471 = vmatmul.f32.vlgmr.msrb.gmra.mxu3 %v875_v2  ;;  %413 = vmatmul.f32.vlgmr.msrb.gmra.mxu1 %v880_v8  ;;  %v502_v2 = vld [vmem:[#allocation7 + $0x50] sm:$0xff]  ;;  %v501_v8 = vld [vmem:[#allocation7 + $0x48] sm:$0xff] }
  0x63   :  { %528 = vmatpush.msra.mxu0 %v507_v23  ;;  %650 = vmatpush.msra.mxu3 %v507_v23 }
  0x64   :  { %557 = vmatpush.msra.mxu1 %v523_v32 }
  0x65   :  { %529 = vmatpush.msra.mxu0 %v506_v24  ;;  %651 = vmatpush.msra.mxu3 %v506_v24 }
  0x66   :  { %558 = vmatpush.msra.mxu1 %v522_v33 }
  0x67   :  { %530 = vmatpush.msra.mxu0 %v505_v25  ;;  %652 = vmatpush.msra.mxu3 %v505_v25 }
  0x68   :  { %445 = vmatmul.f32.gmra.mxu2 %v883_v16  ;;  %v500_v16 = vld [vmem:[#allocation7 + $0x40] sm:$0xff]  ;;  %559 = vmatpush.msra.mxu1 %v521_v34 }
  0x69   :  { %387 = vmatmul.f32.gmra.mxu0 %v885_v21  ;;  %653 = vmatpush.msra.mxu3 %v504_v62  ;;  %v499_v21 = vld [vmem:[#allocation7 + $0x38] sm:$0xff] }
  0x6a   :  { %474 = vmatmul.f32.gmra.mxu3 %v888_v22  ;;  %416 = vmatmul.f32.gmra.mxu1 %v891_v27  ;;  %v498_v22 = vld [vmem:[#allocation7 + $0x30] sm:$0xff]  ;;  %v496_v27 = vld [vmem:[#allocation7 + $0x20] sm:$0xff] }
  0x6b   :  { %531 = vmatpush.msra.mxu0 %v504_v62  ;;  %654 = vmatpush.msra.mxu3 %v503_v1 }
  0x6c   :  { %560 = vmatpush.msra.mxu1 %v520_v35 }
  0x6d   :  { %532 = vmatpush.msra.mxu0 %v503_v1  ;;  %655 = vmatpush.msra.mxu3 %v502_v2  ;;  %v249_v1 = vperm.slane %v246_v37, 1 }
  0x6f   :  { %533 = vmatpush.msra.mxu0 %v502_v2  ;;  %656 = vmatpush.msra.mxu3 %v501_v8 }
  0x70   :  { %448 = vmatmul.f32.gmra.mxu2 %v895_v36  ;;  %v519_v36 = vld [vmem:[#allocation7 + $0xd8] sm:$0xff] }
  0x71   :  { %390 = vmatmul.f32.gmra.mxu0 %v897_v41  ;;  %657 = vmatpush.msra.mxu3 %v500_v16  ;;  %v516_v41 = vld [vmem:[#allocation7 + $0xc0] sm:$0xff] }
  0x72   :  { %477 = vmatmul.f32.gmra.mxu3 %v900_v42  ;;  %419 = vmatmul.f32.gmra.mxu1 %v903_v47 }
  0x73   :  { %534 = vmatpush.msra.mxu0 %v501_v8  ;;  %658 = vmatpush.msra.mxu3 %v499_v21 }
  0x74   :  { %561 = vmatpush.msra.mxu1 %v519_v36 }
  0x75   :  { %535 = vmatpush.msra.mxu0 %v500_v16  ;;  %659 = vmatpush.msra.mxu3 %v498_v22 }
  0x76   :  { %562 = vmatpush.msra.mxu1 %v518_v38 }
  0x77   :  { %536 = vmatpush.msra.mxu0 %v499_v21  ;;  %660 = vmatpush.msra.mxu3 %v497_v26 }
  0x78   :  { %451 = vmatmul.f32.gmra.mxu2 %v907_v56  ;;  %563 = vmatpush.msra.mxu1 %v517_v40 }
  0x79   :  { %393 = vmatmul.f32.gmra.mxu0 %v909_v61  ;;  %661 = vmatpush.msra.mxu3 %v496_v27  ;;  %v510_v61 = vld [vmem:[#allocation7 + $0x90] sm:$0xff] }
  0x7a   :  { %480 = vmatmul.f32.gmra.mxu3 %v912_v63  ;;  %422 = vmatmul.f32.gmra.mxu1 %v915_v6 }
  0x7b   :  { %537 = vmatpush.msra.mxu0 %v498_v22  ;;  %662 = vmatpush.msra.mxu3 %v495_v28 }
  0x7c   :  { %564 = vmatpush.msra.mxu1 %v516_v41 }
  0x7d   :  { %538 = vmatpush.msra.mxu0 %v497_v26  ;;  %663 = vmatpush.msra.mxu3 %v494_v29 }
  0x7e   :  { %565 = vmatpush.msra.mxu1 %v515_v44 }
  0x7f   :  { %539 = vmatpush.msra.mxu0 %v496_v27  ;;  %664 = vmatpush.msra.mxu3 %v493_v30 }
  0x80   :  { %566 = vmatpush.msra.mxu1 %v514_v46 }
  0x81   :  { %540 = vmatpush.msra.mxu0 %v495_v28  ;;  %665 = vmatpush.msra.mxu3 %v492_v31 }
  0x82   :  { %567 = vmatpush.msra.mxu1 %v513_v51 }
  0x83   :  { %541 = vmatpush.msra.mxu0 %v494_v29 }
  0x84   :  { %568 = vmatpush.msra.mxu1 %v512_v53 }
  0x85   :  { %542 = vmatpush.msra.mxu0 %v493_v30 }
  0x86   :  { %569 = vmatpush.msra.mxu1 %v511_v57 }
  0x87   :  { %543 = vmatpush.msra.mxu0 %v492_v31 }
  0x88   :  { %570 = vmatpush.msra.mxu1 %v510_v61  ;;  %v603_v61 = vld [vmem:[#allocation9 + $0x68] sm:$0xff] }
  0x8a   :  { %571 = vmatpush.msra.mxu1 %v509_v0  ;;  %v601_v0 = vld [vmem:[#allocation9 + $0x58] sm:$0xff] }
  0x8c   :  { %572 = vmatpush.msra.mxu1 %v508_v5  ;;  %v598_v5 = vld [vmem:[#allocation9 + $0x40] sm:$0xff] }
  0xb6   :  { %v269_v42 = vpop.f32.mrf.mxu0 }
  0xb7   :  { %v270_v43 = vadd.f32 %v269_v42, %v248_v39 }
  0xba   :  { %v298_v45 = vpop.f32.mrf.mxu1 }
  0xbb   :  { %v299_v47 = vadd.f32 %v298_v45, %v270_v43  ;;  %v327_v48 = vpop.f32.mrf.mxu2 }
  0xbd   :  { %v328_v49 = vadd.f32 %v327_v48, %v299_v47  ;;  %v356_v50 = vpop.f32.mrf.mxu3 }
  0xbf   :  { %v357_v52 = vadd.f32 %v356_v50, %v328_v49 }
  0xc0   :  { %v272_v54 = vpop.f32.mrf.mxu0 }
  0xc1   :  { %v484_v55 = vmax.f32 %v357_v52, 0.0  ;;  %v273_v56 = vadd.f32 %v272_v54, %v248_v39 }
  0xc3   :  { %v301_v58 = vpop.f32.mrf.mxu1  ;;  %544 = vmatmul.f32.vlgmr.msra.gmra.mxu0 %v484_v55 }
  0xc4   :  { %v302_v59 = vadd.f32 %v301_v58, %v273_v56  ;;  %v330_v60 = vpop.f32.mrf.mxu2 }
  0xc6   :  { %v331_v63 = vadd.f32 %v330_v60, %v302_v59  ;;  %v605_v59 = vld [vmem:[#allocation9 + $0x78] sm:$0xff]  ;;  %v604_v60 = vld [vmem:[#allocation9 + $0x70] sm:$0xff] }
  0xc7   :  { %v359_v3 = vpop.f32.mrf.mxu3  ;;  %610 = vmatpush.msra.mxu2 %v605_v59 }
  0xc8   :  { %v360_v4 = vadd.f32 %v359_v3, %v331_v63  ;;  %v602_v63 = vld [vmem:[#allocation9 + $0x60] sm:$0xff]  ;;  %v600_v3 = vld [vmem:[#allocation9 + $0x50] sm:$0xff] }
  0xc9   :  { %611 = vmatpush.msra.mxu2 %v604_v60 }
  0xca   :  { %v486_v6 = vmax.f32 %v360_v4, 0.0  ;;  %v275_v7 = vpop.f32.mrf.mxu0  ;;  %v599_v4 = vld [vmem:[#allocation9 + $0x48] sm:$0xff] }
  0xcb   :  { %v276_v9 = vadd.f32 %v275_v7, %v248_v39  ;;  %612 = vmatpush.msra.mxu2 %v603_v61  ;;  %v596_v7 = vld [vmem:[#allocation9 + $0x30] sm:$0xff] }
  0xcc   :  { %547 = vmatmul.f32.vlgmr.msra.gmra.mxu3 %v486_v6  ;;  %v597_v6 = vld [vmem:[#allocation9 + $0x38] sm:$0xff] }
  0xcd   :  { %v304_v10 = vpop.f32.mrf.mxu1  ;;  %613 = vmatpush.msra.mxu2 %v602_v63 }
  0xce   :  { %v305_v11 = vadd.f32 %v304_v10, %v276_v9  ;;  %v333_v12 = vpop.f32.mrf.mxu2  ;;  %v595_v9 = vld [vmem:[#allocation9 + $0x28] sm:$0xff]  ;;  %v594_v10 = vld [vmem:[#allocation9 + $0x20] sm:$0xff] }
  0xcf   :  { %614 = vmatpush.msra.mxu2 %v601_v0 }
  0xd0   :  { %v334_v13 = vadd.f32 %v333_v12, %v305_v11  ;;  %v593_v11 = vld [vmem:[#allocation9 + $0x18] sm:$0xff]  ;;  %v592_v12 = vld [vmem:[#allocation9 + $0x10] sm:$0xff] }
  0xd1   :  { %v362_v14 = vpop.f32.mrf.mxu3  ;;  %615 = vmatpush.msra.mxu2 %v600_v3 }
  0xd2   :  { %v363_v15 = vadd.f32 %v362_v14, %v334_v13  ;;  %v591_v13 = vld [vmem:[#allocation9 + $0x8] sm:$0xff]  ;;  %v590_v14 = vld [vmem:[#allocation9] sm:$0xff] }
  0xd3   :  { %616 = vmatpush.msra.mxu2 %v599_v4 }
  0xd4   :  { %v488_v17 = vmax.f32 %v363_v15, 0.0  ;;  %v278_v18 = vpop.f32.mrf.mxu0  ;;  %v677_v15 = vld [vmem:[%s957_s4] ss:$0 sm:$0xff] }
  0xd5   :  { %v279_v19 = vadd.f32 %v278_v18, %v248_v39  ;;  %617 = vmatpush.msra.mxu2 %v598_v5 }
  0xd6   :  { %550 = vmatmul.f32.gmra.mxu3 %v488_v17 }
  0xd7   :  { %v307_v20 = vpop.f32.mrf.mxu1  ;;  %618 = vmatpush.msra.mxu2 %v597_v6 }
  0xd8   :  { %v308_v23 = vadd.f32 %v307_v20, %v279_v19  ;;  %v336_v24 = vpop.f32.mrf.mxu2 }
  0xd9   :  { %619 = vmatpush.msra.mxu2 %v596_v7 }
  0xda   :  { %v337_v25 = vadd.f32 %v336_v24, %v308_v23 }
  0xdb   :  { %v365_v62 = vpop.f32.mrf.mxu3  ;;  %620 = vmatpush.msra.mxu2 %v595_v9 }
  0xdc   :  { %v366_v2 = vadd.f32 %v365_v62, %v337_v25 }
  0xdd   :  { %621 = vmatpush.msra.mxu2 %v594_v10 }
  0xde   :  { %v490_v8 = vmax.f32 %v366_v2, 0.0  ;;  %v385_v16 = vpop.f32.mrf.mxu0 }
  0xdf   :  { %v386_v21 = vadd.f32 %v385_v16, %v249_v1  ;;  %v414_v22 = vpop.f32.mrf.mxu1  ;;  %622 = vmatpush.msra.mxu2 %v593_v11 }
  0xe0   :  { %553 = vmatmul.f32.gmra.mxu3 %v490_v8 }
  0xe1   :  { %v415_v26 = vadd.f32 %v414_v22, %v386_v21  ;;  %623 = vmatpush.msra.mxu2 %v592_v12 }
  0xe3   :  { %v443_v27 = vpop.f32.mrf.mxu2  ;;  %624 = vmatpush.msra.mxu2 %v591_v13 }
  0xe4   :  { %v444_v28 = vadd.f32 %v443_v27, %v415_v26 }
  0xe5   :  { %v472_v29 = vpop.f32.mrf.mxu3  ;;  %625 = vmatpush.msra.mxu2 %v590_v14 }
  0xe6   :  { %v473_v30 = vadd.f32 %v472_v29, %v444_v28  ;;  %v388_v31 = vpop.f32.mrf.mxu0 }
  0xe7   :  { %v389_v32 = vadd.f32 %v388_v31, %v249_v1  ;;  %v417_v33 = vpop.f32.mrf.mxu1 }
  0xe8   :  { %v485_v34 = vmax.f32 %v473_v30, 0.0 }
  0xe9   :  { %v418_v35 = vadd.f32 %v417_v33, %v389_v32  ;;  %v678_v32 = vld [vmem:[%s959_s6] ss:$0 sm:$0xff] }
  0xea   :  { %573 = vmatmul.f32.vlgmr.msra.gmra.mxu1 %v485_v34 }
  0xeb   :  { %v446_v36 = vpop.f32.mrf.mxu2 }
  0xec   :  { %v447_v38 = vadd.f32 %v446_v36, %v418_v35 }
  0xed   :  { %v475_v37 = vpop.f32.mrf.mxu3 }
  0xee   :  { %v476_v39 = vadd.f32 %v475_v37, %v447_v38  ;;  %v391_v40 = vpop.f32.mrf.mxu0 }
  0xef   :  { %v392_v41 = vadd.f32 %v391_v40, %v249_v1  ;;  %v420_v42 = vpop.f32.mrf.mxu1 }
  0xf0   :  { %v487_v43 = vmax.f32 %v476_v39, 0.0 }
  0xf1   :  { %v421_v44 = vadd.f32 %v420_v42, %v392_v41 }
  0xf2   :  { %576 = vmatmul.f32.gmra.mxu1 %v487_v43 }
  0xf3   :  { %v449_v45 = vpop.f32.mrf.mxu2 }
  0xf4   :  { %v450_v46 = vadd.f32 %v449_v45, %v421_v44 }
  0xf5   :  { %v478_v47 = vpop.f32.mrf.mxu3 }
  0xf6   :  { %v479_v48 = vadd.f32 %v478_v47, %v450_v46  ;;  %v394_v49 = vpop.f32.mrf.mxu0 }
  0xf7   :  { %v395_v50 = vadd.f32 %v394_v49, %v249_v1  ;;  %v423_v51 = vpop.f32.mrf.mxu1 }
  0xf8   :  { %v489_v52 = vmax.f32 %v479_v48, 0.0 }
  0xf9   :  { %v424_v53 = vadd.f32 %v423_v51, %v395_v50 }
  0xfa   :  { %579 = vmatmul.f32.gmra.mxu1 %v489_v52 }
  0xfb   :  { %v452_v54 = vpop.f32.mrf.mxu2 }
  0xfc   :  { %v453_v55 = vadd.f32 %v452_v54, %v424_v53 }
  0xfd   :  { %v481_v56 = vpop.f32.mrf.mxu3 }
  0xfe   :  { %v482_v57 = vadd.f32 %v481_v56, %v453_v55 }
 0x100   :  { %v491_v58 = vmax.f32 %v482_v57, 0.0 }
 0x102   :  { %582 = vmatmul.f32.gmra.mxu1 %v491_v58 }
 0x140   :  { %v545_v17 = vpop.f32.mrf.mxu0 }
 0x141   :  { %v546_v18 = vadd.f32 %v677_v15, %v545_v17 }
 0x14f   :  { %v548_v19 = vpop.f32.mrf.mxu3 }
 0x150   :  { %v549_v25 = vadd.f32 %v677_v15, %v548_v19 }
 0x159   :  { %v551_v2 = vpop.f32.mrf.mxu3 }
 0x15a   :  { %v552_v16 = vadd.f32 %v677_v15, %v551_v2 }
 0x163   :  { %v554_v27 = vpop.f32.mrf.mxu3 }
 0x164   :  { %v555_v28 = vadd.f32 %v677_v15, %v554_v27 }
 0x167   :  { %v574_v20 = vpop.f32.mrf.mxu1 }
 0x168   :  { %v575_v23 = vadd.f32 %v574_v20, %v546_v18 }
 0x16a   :  { %v586_v24 = vmax.f32 %v575_v23, 0.0 }
 0x16c   :  { %626 = vmatmul.f32.vlgmr.msra.gmra.mxu2 %v586_v24 }
 0x16f   :  { %v577_v62 = vpop.f32.mrf.mxu1 }
 0x170   :  { %v578_v1 = vadd.f32 %v577_v62, %v549_v25 }
 0x172   :  { %v587_v8 = vmax.f32 %v578_v1, 0.0 }
 0x174   :  { %629 = vmatmul.f32.gmra.mxu2 %v587_v8 }
 0x177   :  { %v580_v21 = vpop.f32.mrf.mxu1 }
 0x178   :  { %v581_v22 = vadd.f32 %v580_v21, %v552_v16 }
 0x17a   :  { %v588_v26 = vmax.f32 %v581_v22, 0.0 }
 0x17c   :  { %632 = vmatmul.f32.gmra.mxu2 %v588_v26 }
 0x17f   :  { %v583_v29 = vpop.f32.mrf.mxu1 }
 0x180   :  { %v584_v30 = vadd.f32 %v583_v29, %v555_v28 }
 0x182   :  { %v589_v31 = vmax.f32 %v584_v30, 0.0 }
 0x184   :  { %635 = vmatmul.f32.gmra.mxu2 %v589_v31 }
 0x1ef   :  { %v627_v33 = vpop.f32.mrf.mxu2 }
 0x1f0   :  { %v628_v34 = vadd.f32 %v678_v32, %v627_v33 }
 0x1f2   :  { %639 = vst [vmem:[%s960_s7] sm:$0xff] %v628_v34 }
 0x1f7   :  { %v630_v35 = vpop.f32.mrf.mxu2 }
 0x1f8   :  { %v631_v36 = vadd.f32 %v678_v32, %v630_v35 }
 0x1fa   :  { %640 = vst [vmem:[%s960_s7 + $0x8] sm:$0xff] %v631_v36 }
 0x1ff   :  { %v633_v38 = vpop.f32.mrf.mxu2 }
 0x200   :  { %v634_v37 = vadd.f32 %v678_v32, %v633_v38 }
 0x202   :  { %641 = vst [vmem:[%s960_s7 + $0x10] sm:$0xff] %v634_v37 }
 0x207   :  { %v636_v39 = vpop.f32.mrf.mxu2 }
 0x208   :  { %v637_v40 = vadd.f32 %v678_v32, %v636_v39 }
 0x20a   :  { %642 = vst [vmem:[%s960_s7 + $0x18] sm:$0xff] %v637_v40 }
 0x20b   :  { %647 = vsyncpa [#allocation3], 1 }
 0x20c   :  { %648 = vsyncpa [#allocation5], 1 }
 0x20d   :  { %649 = vsyncpa [#allocation8], 1 }

</bundles_post_ra>
